<compile_context>
chip_gen: v5e
topology: v5e:2x2
jax: 0.10.0
libtpu: 0.0.40
codegen_flags: <defaults>
</compile_context>

<pallas_src>
import functools

import jax
import jax.numpy as jnp
import numpy as np
from jax import lax
from jax.experimental import pallas as pl
from jax.experimental.pallas import tpu as pltpu

NUM_OBJECTS = 15   # max_objects_in_frame
BB_IN_DIM = 5      # bb_in_dim (per-object box feature size)
BB_OUT_DIM = 4     # bb_out_dim
LANE = 128         # lane width / padding target


def _make_kernel(Fdim: int, B: int, H: int):
    """Build the grid-less kernel for static (F, padded-B, H)."""
    H4 = 4 * H

    def kernel(scene_ref, wih_ref, whh_ref, wp_ref, y_ref, xih_scr, h_scr):
        """Everything lives in VMEM (tiny shapes).

        scene_ref : (F*B, 128)   time-major flattened scene features, zero-padded cols
        wih_ref   : (128, 4H)    packed input->hidden gate weights [i|f|g|o], padded rows
        whh_ref   : (H, 4H)      packed hidden->hidden gate weights [i|f|g|o]
        wp_ref    : (H, 128)     predictions_layer weight (transposed), zero-padded cols
        y_ref     : (F*B, 128)   out: predicted boxes (first 4 lanes valid)
        xih_scr   : (F*B, 4H)    scratch: precomputed input projections (2-D, no reshape)
        h_scr     : (F*B, H)     scratch: all hidden states
        """
        # ---- batched input projection: one (F*B,128)x(128,4H) MXU op, straight into 2-D scratch ----
        xih_scr[...] = jnp.dot(scene_ref[...], wih_ref[...],
                               preferred_element_type=jnp.float32)

        # Only the packed recurrent weight (H x 4H = 32 x 128 f32, ~4 vregs) stays resident.
        whh = whh_ref[...]

        # Per-lane activation constants, hoisted out of the loop (broadcasts are not CSE'd).
        # Columns [0,2H) and [3H,4H) are sigmoid gates (i, f, o): sigmoid(x) = 0.5*tanh(0.5x)+0.5.
        # Columns [2H,3H) are the g gate: tanh(x).
        lane_id = lax.broadcasted_iota(jnp.int32, (1, H4), 1)
        is_g = (lane_id >= 2 * H) & (lane_id < 3 * H)
        scale_b = jnp.broadcast_to(jnp.where(is_g, 1.0, 0.5).astype(jnp.float32), (B, H4))
        bias_b = jnp.broadcast_to(jnp.where(is_g, 0.0, 0.5).astype(jnp.float32), (B, H4))

        # ---- sequential LSTM recurrence: bare cell only on the serial h->h chain ----
        def step(t, carry):
            h, c = carry
            row = pl.multiple_of(t * B, B)
            gates = xih_scr[pl.ds(row, B), :] + jnp.dot(
                h, whh, preferred_element_type=jnp.float32)          # (B, 4H)
            # ONE full-vreg tanh covers all four gates.
            act = jnp.tanh(gates * scale_b) * scale_b + bias_b       # (B, 4H)
            i = act[:, 0 * H:1 * H]
            f = act[:, 1 * H:2 * H]
            g = act[:, 2 * H:3 * H]
            o = act[:, 3 * H:4 * H]
            c_new = f * c + i * g
            h_new = o * jnp.tanh(c_new)
            h_scr[pl.ds(row, B), :] = h_new
            return h_new, c_new

        z = jnp.zeros((B, H), jnp.float32)
        # Full unroll only when F is tiny; partial (8-deep) unroll otherwise keeps code size
        # and vreg pressure bounded while still letting the LLO scheduler overlap steps.
        unroll = Fdim if Fdim <= 16 else 8
        lax.fori_loop(0, Fdim, step, (z, z), unroll=unroll)

        # ---- batched prediction head + single lane-dense (128-wide) store ----
        y_ref[...] = jnp.dot(h_scr[...], wp_ref[...],
                             preferred_element_type=jnp.float32)      # (F*B, 128)

    return kernel


def baseline_lstm_forward(x, params):
    """x: (B, F, 15, 5) float32 -> y_boxes (B, F, 4), matching BaselineLstm.forward."""
    B, F, O, T = x.shape
    in_dim = O * T
    H = params["whh"].shape[0]
    out_dim = params["wp"].shape[1]

    Bp = ((B + 7) // 8) * 8          # pad batch to a full f32 sublane group
    in_pad = LANE                    # pad K 75 -> 128 (lane-dense scene tile)
    out_pad = LANE                   # pad output 4 -> 128 (lane-dense store)

    # Plain-JAX glue: flatten objects*features, go time-major (row = t*Bp + b), zero-pad.
    scene = jnp.transpose(x.reshape(B, F, in_dim), (1, 0, 2))                 # (F, B, 75)
    scene = jnp.pad(scene, ((0, 0), (0, Bp - B), (0, in_pad - in_dim)))       # (F, Bp, 128)
    scene_fb = scene.reshape(F * Bp, in_pad)

    wih_p = jnp.pad(params["wih"], ((0, in_pad - in_dim), (0, 0)))            # (128, 4H)
    wp_p = jnp.pad(params["wp"], ((0, 0), (0, out_pad - out_dim)))            # (H, 128)

    vmem = pl.BlockSpec(memory_space=pltpu.MemorySpace.VMEM)
    y_fb = pl.pallas_call(
        _make_kernel(F, Bp, H),
        out_shape=jax.ShapeDtypeStruct((F * Bp, out_pad), jnp.float32),
        in_specs=[vmem] * 4,
        out_specs=vmem,
        scratch_shapes=[pltpu.VMEM((F * Bp, 4 * H), jnp.float32),   # xih (2-D, no reshape)
                        pltpu.VMEM((F * Bp, H), jnp.float32)],      # all hidden states
    )(scene_fb, wih_p, params["whh"], wp_p)

    # TODO(synk): if padded B per core grows to >= 8*num_cores, add a batch grid axis with
    # dimension_semantics=("parallel",) for v7x's 2 TensorCores; if F*B scales so xih_scr
    # nears v7x's 64 MiB VMEM, tile the input projection over F-chunks instead of
    # materializing all of xih.
    y = y_fb.reshape(F, Bp, out_pad)[:, :B, :out_dim]                         # (F, B, 4)
    return jnp.transpose(y, (1, 0, 2))                                        # (B, F, 4)


# ---------------- pure-JAX reference (for correctness check) ----------------
def baseline_lstm_ref(x, params):
    B, F, O, T = x.shape
    scene = x.reshape(B, F, O * T)
    wih, whh, wp = params["wih"], params["whh"], params["wp"]
    H = whh.shape[0]

    def step(carry, xt):
        h, c = carry
        gates = xt @ wih + h @ whh                       # (B, 4H), columns [i|f|g|o]
        i = jax.nn.sigmoid(gates[:, 0 * H:1 * H])
        f = jax.nn.sigmoid(gates[:, 1 * H:2 * H])
        g = jnp.tanh(gates[:, 2 * H:3 * H])
        o = jax.nn.sigmoid(gates[:, 3 * H:4 * H])
        c = f * c + i * g
        h = o * jnp.tanh(c)
        return (h, c), h

    init = (jnp.zeros((B, H), jnp.float32), jnp.zeros((B, H), jnp.float32))
    _, hs = lax.scan(step, init, jnp.transpose(scene, (1, 0, 2)))   # hs: (F, B, H)
    return jnp.einsum('fbh,ho->bfo', hs, wp)                        # (B, F, 4)


def init_params(key, in_dim, hidden, out_dim):
    """Packed-gate layout. To load a real PyTorch checkpoint:
       wih = video_LSTM.weight_ih_l0.T   (in_dim, 4H), columns already [i|f|g|o]
       whh = video_LSTM.weight_hh_l0.T   (H, 4H)
       wp  = predictions_layer.weight.T  (H, 4)        (all layers are bias-free)"""
    ks = jax.random.split(key, 3)
    bound = 1.0 / np.sqrt(hidden)

    def u(k, shape):
        return jax.random.uniform(k, shape, jnp.float32, -bound, bound)

    return {
        "wih": u(ks[0], (in_dim, 4 * hidden)),
        "whh": u(ks[1], (hidden, 4 * hidden)),
        "wp":  u(ks[2], (hidden, out_dim)),
    }


if __name__ == "__main__":
    config = {"videos_hidden_dim": 32}
    B, F = 2, 8
    key = jax.random.PRNGKey(0)
    kx, kp = jax.random.split(key)

    x = jax.random.uniform(kx, (B, F, NUM_OBJECTS, BB_IN_DIM), jnp.float32)
    params = init_params(kp,
                         in_dim=NUM_OBJECTS * BB_IN_DIM,
                         hidden=config["videos_hidden_dim"],
                         out_dim=BB_OUT_DIM)

    y_boxes = jax.block_until_ready(jax.jit(baseline_lstm_forward)(x, params))
    assert y_boxes.shape == (B, F, BB_OUT_DIM)

    y_ref = baseline_lstm_ref(x, params)
    np.testing.assert_allclose(np.asarray(y_boxes), np.asarray(y_ref), rtol=1e-3, atol=1e-4)

    print("KERNEL_OK")
</pallas_src>

<mosaic_0001>
module attributes {stable_mosaic.version = 11 : i64} {
  func.func @kernel(%arg0: memref<64x128xf32, #tpu.memory_space<vmem>>, %arg1: memref<128x128xf32, #tpu.memory_space<vmem>>, %arg2: memref<32x128xf32, #tpu.memory_space<vmem>>, %arg3: memref<32x128xf32, #tpu.memory_space<vmem>>, %arg4: memref<64x128xf32, #tpu.memory_space<vmem>>, %arg5: memref<64x128xf32, #tpu.memory_space<vmem>>, %arg6: memref<64x32xf32, #tpu.memory_space<vmem>>) attributes {dimension_semantics = [], scalar_prefetch = 0 : i64, scratch_operands = 2 : i64, tpu.core_type = #tpu.core_type<tc>} {
    %c0 = arith.constant 0 : index
    %c0_0 = arith.constant 0 : index
    %0 = vector.load %arg0[%c0, %c0_0] : memref<64x128xf32, #tpu.memory_space<vmem>>, vector<64x128xf32>
    %c0_1 = arith.constant 0 : index
    %c0_2 = arith.constant 0 : index
    %1 = vector.load %arg1[%c0_1, %c0_2] : memref<128x128xf32, #tpu.memory_space<vmem>>, vector<128x128xf32>
    %cst = arith.constant dense<0.000000e+00> : vector<64x128xf32>
    %2 = tpu.matmul %0, %1, %cst {dimension_numbers = #tpu.dot_dimension_numbers<[1], [0], [0], [1], [0, 0, 1, 1], [], []>} : vector<64x128xf32>, vector<128x128xf32>, vector<64x128xf32> -> vector<64x128xf32>
    %c0_3 = arith.constant 0 : index
    %c0_4 = arith.constant 0 : index
    %3 = vector.load %arg5[%c0_3, %c0_4] : memref<64x128xf32, #tpu.memory_space<vmem>>, vector<64x128xf32>
    tpu.vector_store %arg5[%c0_3, %c0_4], %2 {strides = array<i32>} : memref<64x128xf32, #tpu.memory_space<vmem>>, vector<64x128xf32>,
    %c0_5 = arith.constant 0 : index
    %c0_6 = arith.constant 0 : index
    %4 = vector.load %arg2[%c0_5, %c0_6] : memref<32x128xf32, #tpu.memory_space<vmem>>, vector<32x128xf32>
    %5 = tpu.iota {dimensions = array<i32: 1>} : vector<1x128xi32>
    %c64_i32 = arith.constant 64 : i32
    %6 = vector.broadcast %c64_i32 : i32 to vector<1x128xi32>
    %7 = arith.cmpi sge, %5, %6 : vector<1x128xi32>
    %c96_i32 = arith.constant 96 : i32
    %8 = vector.broadcast %c96_i32 : i32 to vector<1x128xi32>
    %9 = arith.cmpi slt, %5, %8 : vector<1x128xi32>
    %10 = arith.andi %7, %9 : vector<1x128xi1>
    %cst_7 = arith.constant 1.000000e+00 : f32
    %cst_8 = arith.constant 5.000000e-01 : f32
    %11 = vector.broadcast %cst_7 : f32 to vector<1x128xf32>
    %12 = vector.broadcast %cst_8 : f32 to vector<1x128xf32>
    %13 = arith.select %10, %11, %12 : vector<1x128xi1>, vector<1x128xf32>
    %14 = vector.shape_cast %13 : vector<1x128xf32> to vector<1x128xf32>
    %15 = vector.broadcast %14 : vector<1x128xf32> to vector<8x128xf32>
    %cst_9 = arith.constant 0.000000e+00 : f32
    %cst_10 = arith.constant 5.000000e-01 : f32
    %16 = vector.broadcast %cst_9 : f32 to vector<1x128xf32>
    %17 = vector.broadcast %cst_10 : f32 to vector<1x128xf32>
    %18 = arith.select %10, %16, %17 : vector<1x128xi1>, vector<1x128xf32>
    %19 = vector.shape_cast %18 : vector<1x128xf32> to vector<1x128xf32>
    %20 = vector.broadcast %19 : vector<1x128xf32> to vector<8x128xf32>
    %cst_11 = arith.constant 0.000000e+00 : f32
    %21 = vector.broadcast %cst_11 : f32 to vector<8x32xf32>
    %c0_i32 = arith.constant 0 : i32
    %c8_i32 = arith.constant 8 : i32
    %22 = arith.muli %c0_i32, %c8_i32 : i32
    %23 = tpu.assume_multiple %22, 8 : i32
    %24 = arith.index_cast %23 : i32 to index
    %c0_12 = arith.constant 0 : index
    %25 = vector.load %arg5[%24, %c0_12] : memref<64x128xf32, #tpu.memory_space<vmem>>, vector<8x128xf32>
    %cst_13 = arith.constant dense<0.000000e+00> : vector<8x128xf32>
    %26 = tpu.matmul %21, %4, %cst_13 {dimension_numbers = #tpu.dot_dimension_numbers<[1], [0], [0], [1], [0, 0, 1, 1], [], []>} : vector<8x32xf32>, vector<32x128xf32>, vector<8x128xf32> -> vector<8x128xf32>
    %27 = arith.addf %25, %26 : vector<8x128xf32>
    %28 = arith.mulf %27, %15 : vector<8x128xf32>
    %29 = math.tanh %28 : vector<8x128xf32>
    %30 = arith.mulf %29, %15 : vector<8x128xf32>
    %31 = arith.addf %30, %20 : vector<8x128xf32>
    %32 = vector.extract_strided_slice %31 {offsets = [0, 0], sizes = [8, 32], strides = [1, 1]} : vector<8x128xf32> to vector<8x32xf32>
    %33 = vector.extract_strided_slice %31 {offsets = [0, 32], sizes = [8, 32], strides = [1, 1]} : vector<8x128xf32> to vector<8x32xf32>
    %34 = vector.extract_strided_slice %31 {offsets = [0, 64], sizes = [8, 32], strides = [1, 1]} : vector<8x128xf32> to vector<8x32xf32>
    %35 = vector.extract_strided_slice %31 {offsets = [0, 96], sizes = [8, 32], strides = [1, 1]} : vector<8x128xf32> to vector<8x32xf32>
    %36 = arith.mulf %33, %21 : vector<8x32xf32>
    %37 = arith.mulf %32, %34 : vector<8x32xf32>
    %38 = arith.addf %36, %37 : vector<8x32xf32>
    %39 = math.tanh %38 : vector<8x32xf32>
    %40 = arith.mulf %35, %39 : vector<8x32xf32>
    %41 = arith.index_cast %23 : i32 to index
    %c0_14 = arith.constant 0 : index
    %42 = vector.load %arg6[%41, %c0_14] : memref<64x32xf32, #tpu.memory_space<vmem>>, vector<8x32xf32>
    tpu.vector_store %arg6[%41, %c0_14], %40 {strides = array<i32>} : memref<64x32xf32, #tpu.memory_space<vmem>>, vector<8x32xf32>,
    %c1_i32 = arith.constant 1 : i32
    %c8_i32_15 = arith.constant 8 : i32
    %43 = arith.muli %c1_i32, %c8_i32_15 : i32
    %44 = tpu.assume_multiple %43, 8 : i32
    %45 = arith.index_cast %44 : i32 to index
    %c0_16 = arith.constant 0 : index
    %46 = vector.load %arg5[%45, %c0_16] : memref<64x128xf32, #tpu.memory_space<vmem>>, vector<8x128xf32>
    %cst_17 = arith.constant dense<0.000000e+00> : vector<8x128xf32>
    %47 = tpu.matmul %40, %4, %cst_17 {dimension_numbers = #tpu.dot_dimension_numbers<[1], [0], [0], [1], [0, 0, 1, 1], [], []>} : vector<8x32xf32>, vector<32x128xf32>, vector<8x128xf32> -> vector<8x128xf32>
    %48 = arith.addf %46, %47 : vector<8x128xf32>
    %49 = arith.mulf %48, %15 : vector<8x128xf32>
    %50 = math.tanh %49 : vector<8x128xf32>
    %51 = arith.mulf %50, %15 : vector<8x128xf32>
    %52 = arith.addf %51, %20 : vector<8x128xf32>
    %53 = vector.extract_strided_slice %52 {offsets = [0, 0], sizes = [8, 32], strides = [1, 1]} : vector<8x128xf32> to vector<8x32xf32>
    %54 = vector.extract_strided_slice %52 {offsets = [0, 32], sizes = [8, 32], strides = [1, 1]} : vector<8x128xf32> to vector<8x32xf32>
    %55 = vector.extract_strided_slice %52 {offsets = [0, 64], sizes = [8, 32], strides = [1, 1]} : vector<8x128xf32> to vector<8x32xf32>
    %56 = vector.extract_strided_slice %52 {offsets = [0, 96], sizes = [8, 32], strides = [1, 1]} : vector<8x128xf32> to vector<8x32xf32>
    %57 = arith.mulf %54, %38 : vector<8x32xf32>
    %58 = arith.mulf %53, %55 : vector<8x32xf32>
    %59 = arith.addf %57, %58 : vector<8x32xf32>
    %60 = math.tanh %59 : vector<8x32xf32>
    %61 = arith.mulf %56, %60 : vector<8x32xf32>
    %62 = arith.index_cast %44 : i32 to index
    %c0_18 = arith.constant 0 : index
    %63 = vector.load %arg6[%62, %c0_18] : memref<64x32xf32, #tpu.memory_space<vmem>>, vector<8x32xf32>
    tpu.vector_store %arg6[%62, %c0_18], %61 {strides = array<i32>} : memref<64x32xf32, #tpu.memory_space<vmem>>, vector<8x32xf32>,
    %c2_i32 = arith.constant 2 : i32
    %c8_i32_19 = arith.constant 8 : i32
    %64 = arith.muli %c2_i32, %c8_i32_19 : i32
    %65 = tpu.assume_multiple %64, 8 : i32
    %66 = arith.index_cast %65 : i32 to index
    %c0_20 = arith.constant 0 : index
    %67 = vector.load %arg5[%66, %c0_20] : memref<64x128xf32, #tpu.memory_space<vmem>>, vector<8x128xf32>
    %cst_21 = arith.constant dense<0.000000e+00> : vector<8x128xf32>
    %68 = tpu.matmul %61, %4, %cst_21 {dimension_numbers = #tpu.dot_dimension_numbers<[1], [0], [0], [1], [0, 0, 1, 1], [], []>} : vector<8x32xf32>, vector<32x128xf32>, vector<8x128xf32> -> vector<8x128xf32>
    %69 = arith.addf %67, %68 : vector<8x128xf32>
    %70 = arith.mulf %69, %15 : vector<8x128xf32>
    %71 = math.tanh %70 : vector<8x128xf32>
    %72 = arith.mulf %71, %15 : vector<8x128xf32>
    %73 = arith.addf %72, %20 : vector<8x128xf32>
    %74 = vector.extract_strided_slice %73 {offsets = [0, 0], sizes = [8, 32], strides = [1, 1]} : vector<8x128xf32> to vector<8x32xf32>
    %75 = vector.extract_strided_slice %73 {offsets = [0, 32], sizes = [8, 32], strides = [1, 1]} : vector<8x128xf32> to vector<8x32xf32>
    %76 = vector.extract_strided_slice %73 {offsets = [0, 64], sizes = [8, 32], strides = [1, 1]} : vector<8x128xf32> to vector<8x32xf32>
    %77 = vector.extract_strided_slice %73 {offsets = [0, 96], sizes = [8, 32], strides = [1, 1]} : vector<8x128xf32> to vector<8x32xf32>
    %78 = arith.mulf %75, %59 : vector<8x32xf32>
    %79 = arith.mulf %74, %76 : vector<8x32xf32>
    %80 = arith.addf %78, %79 : vector<8x32xf32>
    %81 = math.tanh %80 : vector<8x32xf32>
    %82 = arith.mulf %77, %81 : vector<8x32xf32>
    %83 = arith.index_cast %65 : i32 to index
    %c0_22 = arith.constant 0 : index
    %84 = vector.load %arg6[%83, %c0_22] : memref<64x32xf32, #tpu.memory_space<vmem>>, vector<8x32xf32>
    tpu.vector_store %arg6[%83, %c0_22], %82 {strides = array<i32>} : memref<64x32xf32, #tpu.memory_space<vmem>>, vector<8x32xf32>,
    %c3_i32 = arith.constant 3 : i32
    %c8_i32_23 = arith.constant 8 : i32
    %85 = arith.muli %c3_i32, %c8_i32_23 : i32
    %86 = tpu.assume_multiple %85, 8 : i32
    %87 = arith.index_cast %86 : i32 to index
    %c0_24 = arith.constant 0 : index
    %88 = vector.load %arg5[%87, %c0_24] : memref<64x128xf32, #tpu.memory_space<vmem>>, vector<8x128xf32>
    %cst_25 = arith.constant dense<0.000000e+00> : vector<8x128xf32>
    %89 = tpu.matmul %82, %4, %cst_25 {dimension_numbers = #tpu.dot_dimension_numbers<[1], [0], [0], [1], [0, 0, 1, 1], [], []>} : vector<8x32xf32>, vector<32x128xf32>, vector<8x128xf32> -> vector<8x128xf32>
    %90 = arith.addf %88, %89 : vector<8x128xf32>
    %91 = arith.mulf %90, %15 : vector<8x128xf32>
    %92 = math.tanh %91 : vector<8x128xf32>
    %93 = arith.mulf %92, %15 : vector<8x128xf32>
    %94 = arith.addf %93, %20 : vector<8x128xf32>
    %95 = vector.extract_strided_slice %94 {offsets = [0, 0], sizes = [8, 32], strides = [1, 1]} : vector<8x128xf32> to vector<8x32xf32>
    %96 = vector.extract_strided_slice %94 {offsets = [0, 32], sizes = [8, 32], strides = [1, 1]} : vector<8x128xf32> to vector<8x32xf32>
    %97 = vector.extract_strided_slice %94 {offsets = [0, 64], sizes = [8, 32], strides = [1, 1]} : vector<8x128xf32> to vector<8x32xf32>
    %98 = vector.extract_strided_slice %94 {offsets = [0, 96], sizes = [8, 32], strides = [1, 1]} : vector<8x128xf32> to vector<8x32xf32>
    %99 = arith.mulf %96, %80 : vector<8x32xf32>
    %100 = arith.mulf %95, %97 : vector<8x32xf32>
    %101 = arith.addf %99, %100 : vector<8x32xf32>
    %102 = math.tanh %101 : vector<8x32xf32>
    %103 = arith.mulf %98, %102 : vector<8x32xf32>
    %104 = arith.index_cast %86 : i32 to index
    %c0_26 = arith.constant 0 : index
    %105 = vector.load %arg6[%104, %c0_26] : memref<64x32xf32, #tpu.memory_space<vmem>>, vector<8x32xf32>
    tpu.vector_store %arg6[%104, %c0_26], %103 {strides = array<i32>} : memref<64x32xf32, #tpu.memory_space<vmem>>, vector<8x32xf32>,
    %c4_i32 = arith.constant 4 : i32
    %c8_i32_27 = arith.constant 8 : i32
    %106 = arith.muli %c4_i32, %c8_i32_27 : i32
    %107 = tpu.assume_multiple %106, 8 : i32
    %108 = arith.index_cast %107 : i32 to index
    %c0_28 = arith.constant 0 : index
    %109 = vector.load %arg5[%108, %c0_28] : memref<64x128xf32, #tpu.memory_space<vmem>>, vector<8x128xf32>
    %cst_29 = arith.constant dense<0.000000e+00> : vector<8x128xf32>
    %110 = tpu.matmul %103, %4, %cst_29 {dimension_numbers = #tpu.dot_dimension_numbers<[1], [0], [0], [1], [0, 0, 1, 1], [], []>} : vector<8x32xf32>, vector<32x128xf32>, vector<8x128xf32> -> vector<8x128xf32>
    %111 = arith.addf %109, %110 : vector<8x128xf32>
    %112 = arith.mulf %111, %15 : vector<8x128xf32>
    %113 = math.tanh %112 : vector<8x128xf32>
    %114 = arith.mulf %113, %15 : vector<8x128xf32>
    %115 = arith.addf %114, %20 : vector<8x128xf32>
    %116 = vector.extract_strided_slice %115 {offsets = [0, 0], sizes = [8, 32], strides = [1, 1]} : vector<8x128xf32> to vector<8x32xf32>
    %117 = vector.extract_strided_slice %115 {offsets = [0, 32], sizes = [8, 32], strides = [1, 1]} : vector<8x128xf32> to vector<8x32xf32>
    %118 = vector.extract_strided_slice %115 {offsets = [0, 64], sizes = [8, 32], strides = [1, 1]} : vector<8x128xf32> to vector<8x32xf32>
    %119 = vector.extract_strided_slice %115 {offsets = [0, 96], sizes = [8, 32], strides = [1, 1]} : vector<8x128xf32> to vector<8x32xf32>
    %120 = arith.mulf %117, %101 : vector<8x32xf32>
    %121 = arith.mulf %116, %118 : vector<8x32xf32>
    %122 = arith.addf %120, %121 : vector<8x32xf32>
    %123 = math.tanh %122 : vector<8x32xf32>
    %124 = arith.mulf %119, %123 : vector<8x32xf32>
    %125 = arith.index_cast %107 : i32 to index
    %c0_30 = arith.constant 0 : index
    %126 = vector.load %arg6[%125, %c0_30] : memref<64x32xf32, #tpu.memory_space<vmem>>, vector<8x32xf32>
    tpu.vector_store %arg6[%125, %c0_30], %124 {strides = array<i32>} : memref<64x32xf32, #tpu.memory_space<vmem>>, vector<8x32xf32>,
    %c5_i32 = arith.constant 5 : i32
    %c8_i32_31 = arith.constant 8 : i32
    %127 = arith.muli %c5_i32, %c8_i32_31 : i32
    %128 = tpu.assume_multiple %127, 8 : i32
    %129 = arith.index_cast %128 : i32 to index
    %c0_32 = arith.constant 0 : index
    %130 = vector.load %arg5[%129, %c0_32] : memref<64x128xf32, #tpu.memory_space<vmem>>, vector<8x128xf32>
    %cst_33 = arith.constant dense<0.000000e+00> : vector<8x128xf32>
    %131 = tpu.matmul %124, %4, %cst_33 {dimension_numbers = #tpu.dot_dimension_numbers<[1], [0], [0], [1], [0, 0, 1, 1], [], []>} : vector<8x32xf32>, vector<32x128xf32>, vector<8x128xf32> -> vector<8x128xf32>
    %132 = arith.addf %130, %131 : vector<8x128xf32>
    %133 = arith.mulf %132, %15 : vector<8x128xf32>
    %134 = math.tanh %133 : vector<8x128xf32>
    %135 = arith.mulf %134, %15 : vector<8x128xf32>
    %136 = arith.addf %135, %20 : vector<8x128xf32>
    %137 = vector.extract_strided_slice %136 {offsets = [0, 0], sizes = [8, 32], strides = [1, 1]} : vector<8x128xf32> to vector<8x32xf32>
    %138 = vector.extract_strided_slice %136 {offsets = [0, 32], sizes = [8, 32], strides = [1, 1]} : vector<8x128xf32> to vector<8x32xf32>
    %139 = vector.extract_strided_slice %136 {offsets = [0, 64], sizes = [8, 32], strides = [1, 1]} : vector<8x128xf32> to vector<8x32xf32>
    %140 = vector.extract_strided_slice %136 {offsets = [0, 96], sizes = [8, 32], strides = [1, 1]} : vector<8x128xf32> to vector<8x32xf32>
    %141 = arith.mulf %138, %122 : vector<8x32xf32>
    %142 = arith.mulf %137, %139 : vector<8x32xf32>
    %143 = arith.addf %141, %142 : vector<8x32xf32>
    %144 = math.tanh %143 : vector<8x32xf32>
    %145 = arith.mulf %140, %144 : vector<8x32xf32>
    %146 = arith.index_cast %128 : i32 to index
    %c0_34 = arith.constant 0 : index
    %147 = vector.load %arg6[%146, %c0_34] : memref<64x32xf32, #tpu.memory_space<vmem>>, vector<8x32xf32>
    tpu.vector_store %arg6[%146, %c0_34], %145 {strides = array<i32>} : memref<64x32xf32, #tpu.memory_space<vmem>>, vector<8x32xf32>,
    %c6_i32 = arith.constant 6 : i32
    %c8_i32_35 = arith.constant 8 : i32
    %148 = arith.muli %c6_i32, %c8_i32_35 : i32
    %149 = tpu.assume_multiple %148, 8 : i32
    %150 = arith.index_cast %149 : i32 to index
    %c0_36 = arith.constant 0 : index
    %151 = vector.load %arg5[%150, %c0_36] : memref<64x128xf32, #tpu.memory_space<vmem>>, vector<8x128xf32>
    %cst_37 = arith.constant dense<0.000000e+00> : vector<8x128xf32>
    %152 = tpu.matmul %145, %4, %cst_37 {dimension_numbers = #tpu.dot_dimension_numbers<[1], [0], [0], [1], [0, 0, 1, 1], [], []>} : vector<8x32xf32>, vector<32x128xf32>, vector<8x128xf32> -> vector<8x128xf32>
    %153 = arith.addf %151, %152 : vector<8x128xf32>
    %154 = arith.mulf %153, %15 : vector<8x128xf32>
    %155 = math.tanh %154 : vector<8x128xf32>
    %156 = arith.mulf %155, %15 : vector<8x128xf32>
    %157 = arith.addf %156, %20 : vector<8x128xf32>
    %158 = vector.extract_strided_slice %157 {offsets = [0, 0], sizes = [8, 32], strides = [1, 1]} : vector<8x128xf32> to vector<8x32xf32>
    %159 = vector.extract_strided_slice %157 {offsets = [0, 32], sizes = [8, 32], strides = [1, 1]} : vector<8x128xf32> to vector<8x32xf32>
    %160 = vector.extract_strided_slice %157 {offsets = [0, 64], sizes = [8, 32], strides = [1, 1]} : vector<8x128xf32> to vector<8x32xf32>
    %161 = vector.extract_strided_slice %157 {offsets = [0, 96], sizes = [8, 32], strides = [1, 1]} : vector<8x128xf32> to vector<8x32xf32>
    %162 = arith.mulf %159, %143 : vector<8x32xf32>
    %163 = arith.mulf %158, %160 : vector<8x32xf32>
    %164 = arith.addf %162, %163 : vector<8x32xf32>
    %165 = math.tanh %164 : vector<8x32xf32>
    %166 = arith.mulf %161, %165 : vector<8x32xf32>
    %167 = arith.index_cast %149 : i32 to index
    %c0_38 = arith.constant 0 : index
    %168 = vector.load %arg6[%167, %c0_38] : memref<64x32xf32, #tpu.memory_space<vmem>>, vector<8x32xf32>
    tpu.vector_store %arg6[%167, %c0_38], %166 {strides = array<i32>} : memref<64x32xf32, #tpu.memory_space<vmem>>, vector<8x32xf32>,
    %c7_i32 = arith.constant 7 : i32
    %c8_i32_39 = arith.constant 8 : i32
    %169 = arith.muli %c7_i32, %c8_i32_39 : i32
    %170 = tpu.assume_multiple %169, 8 : i32
    %171 = arith.index_cast %170 : i32 to index
    %c0_40 = arith.constant 0 : index
    %172 = vector.load %arg5[%171, %c0_40] : memref<64x128xf32, #tpu.memory_space<vmem>>, vector<8x128xf32>
    %cst_41 = arith.constant dense<0.000000e+00> : vector<8x128xf32>
    %173 = tpu.matmul %166, %4, %cst_41 {dimension_numbers = #tpu.dot_dimension_numbers<[1], [0], [0], [1], [0, 0, 1, 1], [], []>} : vector<8x32xf32>, vector<32x128xf32>, vector<8x128xf32> -> vector<8x128xf32>
    %174 = arith.addf %172, %173 : vector<8x128xf32>
    %175 = arith.mulf %174, %15 : vector<8x128xf32>
    %176 = math.tanh %175 : vector<8x128xf32>
    %177 = arith.mulf %176, %15 : vector<8x128xf32>
    %178 = arith.addf %177, %20 : vector<8x128xf32>
    %179 = vector.extract_strided_slice %178 {offsets = [0, 0], sizes = [8, 32], strides = [1, 1]} : vector<8x128xf32> to vector<8x32xf32>
    %180 = vector.extract_strided_slice %178 {offsets = [0, 32], sizes = [8, 32], strides = [1, 1]} : vector<8x128xf32> to vector<8x32xf32>
    %181 = vector.extract_strided_slice %178 {offsets = [0, 64], sizes = [8, 32], strides = [1, 1]} : vector<8x128xf32> to vector<8x32xf32>
    %182 = vector.extract_strided_slice %178 {offsets = [0, 96], sizes = [8, 32], strides = [1, 1]} : vector<8x128xf32> to vector<8x32xf32>
    %183 = arith.mulf %180, %164 : vector<8x32xf32>
    %184 = arith.mulf %179, %181 : vector<8x32xf32>
    %185 = arith.addf %183, %184 : vector<8x32xf32>
    %186 = math.tanh %185 : vector<8x32xf32>
    %187 = arith.mulf %182, %186 : vector<8x32xf32>
    %188 = arith.index_cast %170 : i32 to index
    %c0_42 = arith.constant 0 : index
    %189 = vector.load %arg6[%188, %c0_42] : memref<64x32xf32, #tpu.memory_space<vmem>>, vector<8x32xf32>
    tpu.vector_store %arg6[%188, %c0_42], %187 {strides = array<i32>} : memref<64x32xf32, #tpu.memory_space<vmem>>, vector<8x32xf32>,
    %c8_i32_43 = arith.constant 8 : i32
    %c0_44 = arith.constant 0 : index
    %c0_45 = arith.constant 0 : index
    %190 = vector.load %arg6[%c0_44, %c0_45] : memref<64x32xf32, #tpu.memory_space<vmem>>, vector<64x32xf32>
    %c0_46 = arith.constant 0 : index
    %c0_47 = arith.constant 0 : index
    %191 = vector.load %arg3[%c0_46, %c0_47] : memref<32x128xf32, #tpu.memory_space<vmem>>, vector<32x128xf32>
    %cst_48 = arith.constant dense<0.000000e+00> : vector<64x128xf32>
    %192 = tpu.matmul %190, %191, %cst_48 {dimension_numbers = #tpu.dot_dimension_numbers<[1], [0], [0], [1], [0, 0, 1, 1], [], []>} : vector<64x32xf32>, vector<32x128xf32>, vector<64x128xf32> -> vector<64x128xf32>
    %c0_49 = arith.constant 0 : index
    %c0_50 = arith.constant 0 : index
    %193 = vector.load %arg4[%c0_49, %c0_50] : memref<64x128xf32, #tpu.memory_space<vmem>>, vector<64x128xf32>
    tpu.vector_store %arg4[%c0_49, %c0_50], %192 {strides = array<i32>} : memref<64x128xf32, #tpu.memory_space<vmem>>, vector<64x128xf32>,
    return
  }
}

</mosaic_0001>

<bundles_post_ra>
// kernel: baseline_lstm_forward.1
= control target key start
LH: loop header
LB: loop body
LE: loop exit
PB: predicated region body
PF: predicated region fallthrough
CT: control target
= control target key end

     0   :  { %v677_v11 = vmov 0.0   ;;  %v94_v22 = vlaneseq  ;;  %v678_v26 = vmov 0.5   ;;  %s680_s30 = smov 32   ;;  %vm102_vm3 = vcmask 261120   ;;  %s958_s1 = inlined_call_operand.vmem [shape: f32[128,128], index: 1, kind: input, shape index: {}]   ;;  %s959_s2 = inlined_call_operand.vmem [shape: f32[32,128], index: 2, kind: input, shape index: {}]   ;;  %s960_s0 = inlined_call_operand.vmem [shape: f32[64,128], index: 0, kind: input, shape index: {}]   ;;  %s961_s3 = inlined_call_operand.vmem [shape: f32[32,128], index: 3, kind: input, shape index: {}]   ;;  %s962_s4 = inlined_call_operand.vmem [shape: f32[64,128], index: 4, kind: output, shape index: {}]  }
   0x1   :  { %v40_v0 = vld [vmem:[%s958_s1 + $0x78] sm:$0xff]  ;;  %v39_v1 = vld [vmem:[%s958_s1 + $0x70] sm:$0xff]  ;;  %v38_v2 = vld [vmem:[%s958_s1 + $0x68] sm:$0xff] }
   0x2   :  { %41 = vmatpush.msra.mxu0 %v40_v0  ;;  %621 = vmatpush.msra.mxu1 %v40_v0  ;;  %v718_v3 = vld [vmem:[%s959_s2 + $0x18] sm:$0xff]  ;;  %v37_v4 = vld [vmem:[%s958_s1 + $0x60] sm:$0xff]  ;;  %v727_v5 = vld [vmem:[%s959_s2 + $0x10] sm:$0xff]  ;;  %v95_v23 = vand.u32 127, %v94_v22 }
   0x3   :  { %118 = vmatpush.msra.mxu2 %v718_v3  ;;  %221 = vmatpush.msra.mxu3 %v718_v3  ;;  %v733_v6 = vld [vmem:[%s959_s2 + $0x8] sm:$0xff]  ;;  %v36_v7 = vld [vmem:[%s958_s1 + $0x58] sm:$0xff]  ;;  %v743_v8 = vld [vmem:[%s959_s2] sm:$0xff] }
   0x4   :  { %42 = vmatpush.msra.mxu0 %v39_v1  ;;  %622 = vmatpush.msra.mxu1 %v39_v1  ;;  %v35_v9 = vld [vmem:[%s958_s1 + $0x50] sm:$0xff]  ;;  %v34_v10 = vld [vmem:[%s958_s1 + $0x48] sm:$0xff]  ;;  %v33_v12 = vld [vmem:[%s958_s1 + $0x40] sm:$0xff]  ;;  %vm96_vm0 = vcmp.ge.s32.totalorder %v95_v23, 64  ;;  %vm97_vm1 = vcmp.lt.s32.totalorder %v95_v23, 96 }
   0x5   :  { %119 = vmatpush.msra.mxu2 %v727_v5  ;;  %222 = vmatpush.msra.mxu3 %v727_v5  ;;  %v32_v13 = vld [vmem:[%s958_s1 + $0x38] sm:$0xff]  ;;  %v31_v14 = vld [vmem:[%s958_s1 + $0x30] sm:$0xff]  ;;  %v30_v15 = vld [vmem:[%s958_s1 + $0x28] sm:$0xff] }
   0x6   :  { %43 = vmatpush.msra.mxu0 %v38_v2  ;;  %623 = vmatpush.msra.mxu1 %v38_v2  ;;  %v29_v16 = vld [vmem:[%s958_s1 + $0x20] sm:$0xff]  ;;  %v28_v17 = vld [vmem:[%s958_s1 + $0x18] sm:$0xff]  ;;  %v27_v18 = vld [vmem:[%s958_s1 + $0x10] sm:$0xff] }
   0x7   :  { %120 = vmatpush.msra.mxu2 %v733_v6  ;;  %223 = vmatpush.msra.mxu3 %v733_v6  ;;  %v26_v19 = vld [vmem:[%s958_s1 + $0x8] sm:$0xff]  ;;  %v25_v20 = vld [vmem:[%s958_s1] sm:$0xff]  ;;  %vm98_vm2 = vmand %vm96_vm0, %vm97_vm1  ;;  %s679_s1 = smov 64  }
   0x8   :  { %44 = vmatpush.msra.mxu0 %v37_v4  ;;  %624 = vmatpush.msra.mxu1 %v37_v4  ;;  %v17_v21 = vld [vmem:[%s960_s0] sm:$0xff]  ;;  %v801_v27 = vsel %vm98_vm2, 1.0, %v678_v26  ;;  %v804_v31 = vsel %vm98_vm2, 0.0, %v678_v26  ;;  %v18_v42 = vld [vmem:[%s960_s0 + $0x8] sm:$0xff]  ;;  %v19_v59 = vld [vmem:[%s960_s0 + $0x10] sm:$0xff] }
   0x9   :  { %121 = vmatpush.msra.mxu2 %v743_v8  ;;  %224 = vmatpush.msra.mxu3 %v743_v8 }
   0xa   :  { %45 = vmatpush.msra.mxu0 %v36_v7  ;;  %625 = vmatpush.msra.mxu1 %v36_v7 }
   0xb   :  { %122 = vmatmul.f32.vlgmr.msra.gmra.mxu2 %v677_v11  ;;  %377 = vmatpush.msrb.mxu3 %v718_v3 }
   0xc   :  { %46 = vmatpush.msra.mxu0 %v35_v9  ;;  %169 = vmatpush.msrb.mxu2 %v718_v3 }
   0xd   :  { %626 = vmatpush.msra.mxu1 %v35_v9  ;;  %378 = vmatpush.msrb.mxu3 %v727_v5 }
   0xe   :  { %47 = vmatpush.msra.mxu0 %v34_v10  ;;  %170 = vmatpush.msrb.mxu2 %v727_v5 }
   0xf   :  { %627 = vmatpush.msra.mxu1 %v34_v10  ;;  %379 = vmatpush.msrb.mxu3 %v733_v6 }
  0x10   :  { %48 = vmatpush.msra.mxu0 %v33_v12  ;;  %171 = vmatpush.msrb.mxu2 %v733_v6 }
  0x11   :  { %628 = vmatpush.msra.mxu1 %v33_v12  ;;  %380 = vmatpush.msrb.mxu3 %v743_v8 }
  0x12   :  { %49 = vmatpush.msra.mxu0 %v32_v13  ;;  %172 = vmatpush.msrb.mxu2 %v743_v8 }
  0x13   :  { %629 = vmatpush.msra.mxu1 %v32_v13 }
  0x14   :  { %50 = vmatpush.msra.mxu0 %v31_v14  ;;  %325 = vmatpush.msra.mxu2 %v718_v3 }
  0x15   :  { %630 = vmatpush.msra.mxu1 %v31_v14  ;;  %v22_v14 = vld [vmem:[%s960_s0 + $0x28] sm:$0xff] }
  0x16   :  { %51 = vmatpush.msra.mxu0 %v30_v15  ;;  %326 = vmatpush.msra.mxu2 %v727_v5 }
  0x17   :  { %631 = vmatpush.msra.mxu1 %v30_v15  ;;  %v23_v15 = vld [vmem:[%s960_s0 + $0x30] sm:$0xff] }
  0x18   :  { %52 = vmatpush.msra.mxu0 %v29_v16  ;;  %327 = vmatpush.msra.mxu2 %v733_v6 }
  0x19   :  { %632 = vmatpush.msra.mxu1 %v29_v16  ;;  %v24_v16 = vld [vmem:[%s960_s0 + $0x38] sm:$0xff] }
  0x1a   :  { %53 = vmatpush.msra.mxu0 %v28_v17  ;;  %328 = vmatpush.msra.mxu2 %v743_v8 }
  0x1b   :  { %633 = vmatpush.msra.mxu1 %v28_v17 }
  0x1c   :  { %54 = vmatpush.msra.mxu0 %v27_v18 }
  0x1d   :  { %634 = vmatpush.msra.mxu1 %v27_v18 }
  0x1e   :  { %55 = vmatpush.msra.mxu0 %v26_v19 }
  0x1f   :  { %635 = vmatpush.msra.mxu1 %v26_v19 }
  0x20   :  { %56 = vmatpush.msra.mxu0 %v25_v20 }
  0x21   :  { %57 = vmatmul.f32.vlgmr.msra.gmra.mxu0 %v17_v21  ;;  %636 = vmatpush.msra.mxu1 %v25_v20 }
  0x22   :  { %72 = vmatmul.f32.vlgmr.msra.gmra.mxu1 %v22_v14 }
  0x23   :  { %273 = vmatpush.msrb.mxu1 %v718_v3 }
  0x25   :  { %274 = vmatpush.msrb.mxu1 %v727_v5 }
  0x27   :  { %275 = vmatpush.msrb.mxu1 %v733_v6 }
  0x29   :  { %276 = vmatpush.msrb.mxu1 %v743_v8  ;;  %60 = vmatmul.f32.gmra.mxu0 %v18_v42 }
  0x2a   :  { %75 = vmatmul.f32.gmra.mxu1 %v23_v15 }
  0x2b   :  { %429 = vmatpush.msra.mxu1 %v718_v3 }
  0x2d   :  { %430 = vmatpush.msra.mxu1 %v727_v5 }
  0x2f   :  { %431 = vmatpush.msra.mxu1 %v733_v6 }
  0x31   :  { %63 = vmatmul.f32.gmra.mxu0 %v19_v59  ;;  %432 = vmatpush.msra.mxu1 %v743_v8 }
  0x32   :  { %78 = vmatmul.f32.gmra.mxu1 %v24_v16 }
  0x8e   :  { %v123_v24 = vpop.f32.mrf.mxu2 }
  0x9e   :  { %v58_v25 = vpop.f32.mrf.mxu0 }
  0x9f   :  { %v126_v28 = vadd.f32 %v123_v24, %v58_v25 }
  0xa1   :  { %v127_v29 = vmul.f32 %v126_v28, %v801_v27 }
  0xa3   :  { %645 = vtanh.f32 %v127_v29 }
  0xa6   :  { %v61_v44 = vpop.f32.mrf.mxu0 }
  0xa9   :  { %v646_v30 = vpop.eup %645 }
  0xaa   :  { %v129_v32 = vmul.f32 %v646_v30, %v801_v27 }
  0xac   :  { %v130_v33 = vadd.f32 %v129_v32, %v804_v31 }
  0xae   :  { %133 = vrot.lane.b32.xlu0 %v130_v33, %s679_s1  ;;  %v131_v36 = vmul.f32 0.0, %v130_v33  ;;  %v64_v61 = vpop.f32.mrf.mxu0 }
 0x120   :  { %v134_v34 = vpop.permute.xlu0 %133 }
 0x121   :  { %v136_v35 = vmul.f32 %v134_v34, %v130_v33 }
 0x123   :  { %138 = vrot.lane.b32.xlu0 %v136_v35, %s680_s30 }
 0x195   :  { %v139_v37 = vpop.permute.xlu0 %138 }
 0x196   :  { %v141_v38 = vadd.f32 %v139_v37, %v131_v36  ;;  %v21_v37 = vld [vmem:[%s960_s0 + $0x20] sm:$0xff] }
 0x198   :  { %647 = vtanh.f32 %v141_v38 }
 0x19e   :  { %v648_v39 = vpop.eup %647 }
 0x19f   :  { %144 = vrot.lane.b32.xlu1 %v648_v39, %s679_s1 }
 0x211   :  { %v145_v40 = vpop.permute.xlu1 %144 }
 0x212   :  { %v147_v41 = vmul.f32 %v145_v40, %v130_v33 }
 0x214   :  { %149 = vrot.lane.b32.xlu1 %v147_v41, %s680_s30 }
 0x286   :  { %v150_v43 = vpop.permute.xlu1 %149 }
 0x287   :  { %152 = vst.msk [vmem:[#allocation3] sm:$0xff] %vm102_vm3, %v150_v43  ;;  %606 = vmatmul.msk.f32.vlgmr.msrb.gmra.mxu2 %vm102_vm3, %v150_v43 }
 0x288   :  { %481 = vmatpush.msrb.mxu2 %v718_v3  ;;  %v20_v3 = vld [vmem:[%s960_s0 + $0x18] sm:$0xff] }
 0x289   :  { %66 = vmatmul.f32.gmra.mxu0 %v20_v3 }
 0x28a   :  { %482 = vmatpush.msrb.mxu2 %v727_v5 }
 0x28c   :  { %483 = vmatpush.msrb.mxu2 %v733_v6  ;;  %v858_v6 = vpop.f32.mrf.mxu1 }
 0x28e   :  { %484 = vmatpush.msrb.mxu2 %v743_v8 }
 0x291   :  { %69 = vmatmul.f32.gmra.mxu0 %v21_v37 }
 0x294   :  { %v860_v8 = vpop.f32.mrf.mxu1 }
 0x29c   :  { %v862_v19 = vpop.f32.mrf.mxu1 }
 0x306   :  { %v67_v20 = vpop.f32.mrf.mxu0 }
 0x30a   :  { %v174_v45 = vpop.f32.mrf.mxu2 }
 0x30b   :  { %v177_v46 = vadd.f32 %v174_v45, %v61_v44 }
 0x30d   :  { %v178_v47 = vmul.f32 %v177_v46, %v801_v27 }
 0x30e   :  { %v70_v39 = vpop.f32.mrf.mxu0 }
 0x30f   :  { %649 = vtanh.f32 %v178_v47 }
 0x315   :  { %v650_v48 = vpop.eup %649 }
 0x316   :  { %v180_v49 = vmul.f32 %v650_v48, %v801_v27 }
 0x318   :  { %v181_v50 = vadd.f32 %v180_v49, %v804_v31 }
 0x31a   :  { %184 = vrot.lane.b32.xlu2 %v181_v50, %s679_s1  ;;  %v182_v53 = vmul.f32 %v181_v50, %v141_v38 }
 0x374   :  { %v185_v51 = vpop.permute.xlu2 %184 }
 0x375   :  { %v187_v52 = vmul.f32 %v185_v51, %v181_v50 }
 0x377   :  { %189 = vrot.lane.b32.xlu2 %v187_v52, %s680_s30 }
 0x3d1   :  { %v190_v54 = vpop.permute.xlu2 %189 }
 0x3d2   :  { %v192_v55 = vadd.f32 %v190_v54, %v182_v53  ;;  %v528_v54 = vld [vmem:[%s961_s3 + $0x18] sm:$0xff] }
 0x3d4   :  { %651 = vtanh.f32 %v192_v55 }
 0x3da   :  { %v652_v56 = vpop.eup %651 }
 0x3db   :  { %195 = vrot.lane.b32.xlu0 %v652_v56, %s679_s1  ;;  %v526_v56 = vld [vmem:[%s961_s3 + $0x8] sm:$0xff] }
 0x44d   :  { %v196_v57 = vpop.permute.xlu0 %195 }
 0x44e   :  { %v198_v58 = vmul.f32 %v196_v57, %v181_v50  ;;  %v525_v57 = vld [vmem:[%s961_s3] sm:$0xff] }
 0x450   :  { %200 = vrot.lane.b32.xlu1 %v198_v58, %s680_s30 }
 0x4c2   :  { %v201_v60 = vpop.permute.xlu1 %200 }
 0x4c3   :  { %204 = vst.msk [vmem:[#allocation3 + $0x8] sm:$0xff] %vm102_vm3, %v201_v60  ;;  %607 = vmatmul.msk.f32.vlgmr.msra.gmra.mxu3 %vm102_vm3, %v201_v60 }
 0x4c4   :  { %637 = vmatpush.msra.mxu3 %v528_v54 }
 0x546   :  { %v226_v62 = vpop.f32.mrf.mxu3 }
 0x547   :  { %v229_v63 = vadd.f32 %v226_v62, %v64_v61 }
 0x549   :  { %v230_v0 = vmul.f32 %v229_v63, %v801_v27 }
 0x54b   :  { %653 = vtanh.f32 %v230_v0 }
 0x551   :  { %v654_v1 = vpop.eup %653 }
 0x552   :  { %v232_v2 = vmul.f32 %v654_v1, %v801_v27 }
 0x554   :  { %v233_v4 = vadd.f32 %v232_v2, %v804_v31 }
 0x556   :  { %236 = vrot.lane.b32.xlu2 %v233_v4, %s679_s1  ;;  %v234_v10 = vmul.f32 %v233_v4, %v192_v55  ;;  %v527_v55 = vld [vmem:[%s961_s3 + $0x10] sm:$0xff] }
 0x557   :  { %638 = vmatpush.msra.mxu3 %v527_v55 }
 0x559   :  { %639 = vmatpush.msra.mxu3 %v526_v56 }
 0x55b   :  { %640 = vmatpush.msra.mxu3 %v525_v57 }
 0x5b0   :  { %v237_v7 = vpop.permute.xlu2 %236 }
 0x5b1   :  { %v239_v9 = vmul.f32 %v237_v7, %v233_v4 }
 0x5b3   :  { %241 = vrot.lane.b32.xlu0 %v239_v9, %s680_s30 }
 0x625   :  { %v242_v11 = vpop.permute.xlu0 %241 }
 0x626   :  { %v244_v12 = vadd.f32 %v242_v11, %v234_v10 }
 0x628   :  { %655 = vtanh.f32 %v244_v12 }
 0x62e   :  { %v656_v13 = vpop.eup %655 }
 0x62f   :  { %247 = vrot.lane.b32.xlu1 %v656_v13, %s679_s1 }
 0x6a1   :  { %v248_v17 = vpop.permute.xlu1 %247 }
 0x6a2   :  { %v250_v18 = vmul.f32 %v248_v17, %v233_v4 }
 0x6a4   :  { %252 = vrot.lane.b32.xlu2 %v250_v18, %s680_s30 }
 0x6fe   :  { %v253_v5 = vpop.permute.xlu2 %252 }
 0x6ff   :  { %256 = vst.msk [vmem:[#allocation3 + $0x10] sm:$0xff] %vm102_vm3, %v253_v5  ;;  %608 = vmatmul.msk.f32.vlgmr.msrb.gmra.mxu1 %vm102_vm3, %v253_v5 }
 0x706   :  { %v519_v59 = vld [vmem:[#allocation3 + $0x10] sm:$0xff] }
 0x77c   :  { %v278_v21 = vpop.f32.mrf.mxu1 }
 0x77d   :  { %v281_v22 = vadd.f32 %v278_v21, %v67_v20 }
 0x77f   :  { %v282_v23 = vmul.f32 %v281_v22, %v801_v27 }
 0x781   :  { %657 = vtanh.f32 %v282_v23 }
 0x787   :  { %v658_v24 = vpop.eup %657 }
 0x788   :  { %v284_v25 = vmul.f32 %v658_v24, %v801_v27 }
 0x78a   :  { %v285_v26 = vadd.f32 %v284_v25, %v804_v31 }
 0x78c   :  { %288 = vrot.lane.b32.xlu0 %v285_v26, %s679_s1  ;;  %v286_v30 = vmul.f32 %v285_v26, %v244_v12 }
 0x7fe   :  { %v289_v28 = vpop.permute.xlu0 %288 }
 0x7ff   :  { %v291_v29 = vmul.f32 %v289_v28, %v285_v26 }
 0x801   :  { %293 = vrot.lane.b32.xlu1 %v291_v29, %s680_s30 }
 0x873   :  { %v294_v32 = vpop.permute.xlu1 %293 }
 0x874   :  { %v296_v33 = vadd.f32 %v294_v32, %v286_v30 }
 0x876   :  { %659 = vtanh.f32 %v296_v33 }
 0x87c   :  { %v660_v34 = vpop.eup %659 }
 0x87d   :  { %299 = vrot.lane.b32.xlu2 %v660_v34, %s679_s1 }
 0x8d7   :  { %v300_v35 = vpop.permute.xlu2 %299 }
 0x8d8   :  { %v302_v36 = vmul.f32 %v300_v35, %v285_v26 }
 0x8da   :  { %304 = vrot.lane.b32.xlu0 %v302_v36, %s680_s30  ;;  %v517_v36 = vld [vmem:[#allocation3] sm:$0xff] }
 0x94c   :  { %v305_v38 = vpop.permute.xlu0 %304 }
 0x94d   :  { %308 = vst.msk [vmem:[#allocation3 + $0x18] sm:$0xff] %vm102_vm3, %v305_v38  ;;  %609 = vmatmul.msk.f32.vlgmr.msra.gmra.mxu2 %vm102_vm3, %v305_v38  ;;  %v518_v38 = vld [vmem:[#allocation3 + $0x8] sm:$0xff] }
 0x94e   :  { %565 = vmatpush.msra.mxu2 %v528_v54 }
 0x950   :  { %566 = vmatpush.msra.mxu2 %v527_v55 }
 0x952   :  { %567 = vmatpush.msra.mxu2 %v526_v56 }
 0x954   :  { %568 = vmatpush.msra.mxu2 %v525_v57  ;;  %v520_v60 = vld [vmem:[#allocation3 + $0x18] sm:$0xff] }
 0x9d0   :  { %v330_v40 = vpop.f32.mrf.mxu2 }
 0x9d1   :  { %v333_v41 = vadd.f32 %v330_v40, %v70_v39 }
 0x9d3   :  { %v334_v42 = vmul.f32 %v333_v41, %v801_v27 }
 0x9d5   :  { %661 = vtanh.f32 %v334_v42 }
 0x9db   :  { %v662_v43 = vpop.eup %661 }
 0x9dc   :  { %v336_v44 = vmul.f32 %v662_v43, %v801_v27 }
 0x9de   :  { %v337_v45 = vadd.f32 %v336_v44, %v804_v31 }
 0x9e0   :  { %340 = vrot.lane.b32.xlu1 %v337_v45, %s679_s1  ;;  %v338_v48 = vmul.f32 %v337_v45, %v296_v33 }
 0xa52   :  { %v341_v46 = vpop.permute.xlu1 %340 }
 0xa53   :  { %v343_v47 = vmul.f32 %v341_v46, %v337_v45 }
 0xa55   :  { %345 = vrot.lane.b32.xlu2 %v343_v47, %s680_s30 }
 0xaaf   :  { %v346_v49 = vpop.permute.xlu2 %345 }
 0xab0   :  { %v348_v50 = vadd.f32 %v346_v49, %v338_v48 }
 0xab2   :  { %663 = vtanh.f32 %v348_v50 }
 0xab8   :  { %v664_v51 = vpop.eup %663 }
 0xab9   :  { %351 = vrot.lane.b32.xlu0 %v664_v51, %s679_s1 }
 0xb2b   :  { %v352_v52 = vpop.permute.xlu0 %351 }
 0xb2c   :  { %v354_v53 = vmul.f32 %v352_v52, %v337_v45 }
 0xb2e   :  { %356 = vrot.lane.b32.xlu1 %v354_v53, %s680_s30 }
 0xba0   :  { %v357_v58 = vpop.permute.xlu1 %356 }
 0xba1   :  { %360 = vst.msk [vmem:[#allocation3 + $0x20] sm:$0xff] %vm102_vm3, %v357_v58  ;;  %610 = vmatmul.msk.f32.vlgmr.msrb.gmra.mxu3 %vm102_vm3, %v357_v58 }
 0xba8   :  { %v521_v61 = vld [vmem:[#allocation3 + $0x20] sm:$0xff] }
 0xba9   :  { %615 = vmatmul.msk.f32.vlgmr.msra.gmra.mxu3 %vm102_vm3, %v519_v59 }
 0xbb1   :  { %616 = vmatmul.msk.f32.gmra.mxu3 %vm102_vm3, %v520_v60 }
 0xbb9   :  { %617 = vmatmul.msk.f32.gmra.mxu3 %vm102_vm3, %v521_v61 }
 0xc24   :  { %v382_v62 = vpop.f32.mrf.mxu3 }
 0xc25   :  { %v385_v63 = vadd.f32 %v382_v62, %v858_v6 }
 0xc27   :  { %v386_v0 = vmul.f32 %v385_v63, %v801_v27 }
 0xc29   :  { %665 = vtanh.f32 %v386_v0 }
 0xc2c   :  { %v576_v1 = vpop.f32.mrf.mxu3 }
 0xc2d   :  { %596 = vst [vmem:[%s962_s4 + $0x10] sm:$0xff] %v576_v1 }
 0xc2f   :  { %v666_v2 = vpop.eup %665 }
 0xc30   :  { %v388_v4 = vmul.f32 %v666_v2, %v801_v27 }
 0xc32   :  { %v389_v7 = vadd.f32 %v388_v4, %v804_v31 }
 0xc34   :  { %v579_v9 = vpop.f32.mrf.mxu3  ;;  %392 = vrot.lane.b32.xlu2 %v389_v7, %s679_s1  ;;  %v390_v13 = vmul.f32 %v389_v7, %v348_v50 }
 0xc35   :  { %597 = vst [vmem:[%s962_s4 + $0x18] sm:$0xff] %v579_v9 }
 0xc3c   :  { %v582_v10 = vpop.f32.mrf.mxu3 }
 0xc3d   :  { %598 = vst [vmem:[%s962_s4 + $0x20] sm:$0xff] %v582_v10 }
 0xc8e   :  { %v393_v11 = vpop.permute.xlu2 %392 }
 0xc8f   :  { %v395_v12 = vmul.f32 %v393_v11, %v389_v7 }
 0xc91   :  { %397 = vrot.lane.b32.xlu0 %v395_v12, %s680_s30 }
 0xd03   :  { %v398_v14 = vpop.permute.xlu0 %397 }
 0xd04   :  { %v400_v15 = vadd.f32 %v398_v14, %v390_v13 }
 0xd06   :  { %667 = vtanh.f32 %v400_v15 }
 0xd0c   :  { %v668_v16 = vpop.eup %667 }
 0xd0d   :  { %403 = vrot.lane.b32.xlu1 %v668_v16, %s679_s1 }
 0xd7f   :  { %v404_v17 = vpop.permute.xlu1 %403 }
 0xd80   :  { %v406_v18 = vmul.f32 %v404_v17, %v389_v7 }
 0xd82   :  { %408 = vrot.lane.b32.xlu2 %v406_v18, %s680_s30 }
 0xddc   :  { %v409_v3 = vpop.permute.xlu2 %408 }
 0xddd   :  { %412 = vst.msk [vmem:[#allocation3 + $0x28] sm:$0xff] %vm102_vm3, %v409_v3  ;;  %611 = vmatmul.msk.f32.vlgmr.msra.gmra.mxu1 %vm102_vm3, %v409_v3 }
 0xde4   :  { %v522_v5 = vld [vmem:[#allocation3 + $0x28] sm:$0xff] }
 0xde5   :  { %618 = vmatmul.msk.f32.gmra.mxu3 %vm102_vm3, %v522_v5 }
 0xe5a   :  { %v434_v6 = vpop.f32.mrf.mxu1 }
 0xe5b   :  { %v437_v20 = vadd.f32 %v434_v6, %v860_v8 }
 0xe5d   :  { %v438_v21 = vmul.f32 %v437_v20, %v801_v27 }
 0xe5f   :  { %669 = vtanh.f32 %v438_v21 }
 0xe65   :  { %v670_v22 = vpop.eup %669 }
 0xe66   :  { %v440_v23 = vmul.f32 %v670_v22, %v801_v27 }
 0xe68   :  { %v585_v24 = vpop.f32.mrf.mxu3  ;;  %v441_v25 = vadd.f32 %v440_v23, %v804_v31 }
 0xe69   :  { %599 = vst [vmem:[%s962_s4 + $0x28] sm:$0xff] %v585_v24 }
 0xe6a   :  { %444 = vrot.lane.b32.xlu0 %v441_v25, %s679_s1  ;;  %v442_v8 = vmul.f32 %v441_v25, %v400_v15 }
 0xedc   :  { %v445_v26 = vpop.permute.xlu0 %444 }
 0xedd   :  { %v447_v28 = vmul.f32 %v445_v26, %v441_v25 }
 0xedf   :  { %449 = vrot.lane.b32.xlu1 %v447_v28, %s680_s30 }
 0xf51   :  { %v450_v29 = vpop.permute.xlu1 %449 }
 0xf52   :  { %v452_v30 = vadd.f32 %v450_v29, %v442_v8 }
 0xf54   :  { %671 = vtanh.f32 %v452_v30 }
 0xf5a   :  { %v672_v32 = vpop.eup %671 }
 0xf5b   :  { %455 = vrot.lane.b32.xlu2 %v672_v32, %s679_s1 }
 0xfb5   :  { %v456_v33 = vpop.permute.xlu2 %455 }
 0xfb6   :  { %v458_v34 = vmul.f32 %v456_v33, %v441_v25 }
 0xfb8   :  { %460 = vrot.lane.b32.xlu0 %v458_v34, %s680_s30 }
0x102a   :  { %v461_v35 = vpop.permute.xlu0 %460 }
0x102b   :  { %464 = vst.msk [vmem:[#allocation3 + $0x30] sm:$0xff] %vm102_vm3, %v461_v35  ;;  %612 = vmatmul.msk.f32.vlgmr.msrb.gmra.mxu2 %vm102_vm3, %v461_v35 }
0x1032   :  { %v523_v37 = vld [vmem:[#allocation3 + $0x30] sm:$0xff] }
0x1033   :  { %613 = vmatmul.msk.f32.vlgmr.msra.gmra.mxu2 %vm102_vm3, %v517_v36  ;;  %619 = vmatmul.msk.f32.gmra.mxu3 %vm102_vm3, %v523_v37 }
0x103b   :  { %614 = vmatmul.msk.f32.gmra.mxu2 %vm102_vm3, %v518_v38 }
0x10ae   :  { %v486_v39 = vpop.f32.mrf.mxu2 }
0x10af   :  { %v489_v40 = vadd.f32 %v486_v39, %v862_v19 }
0x10b1   :  { %v490_v41 = vmul.f32 %v489_v40, %v801_v27 }
0x10b3   :  { %673 = vtanh.f32 %v490_v41 }
0x10b6   :  { %v570_v42 = vpop.f32.mrf.mxu2  ;;  %v588_v43 = vpop.f32.mrf.mxu3 }
0x10b7   :  { %594 = vst [vmem:[%s962_s4] sm:$0xff] %v570_v42 }
0x10b8   :  { %600 = vst [vmem:[%s962_s4 + $0x30] sm:$0xff] %v588_v43 }
0x10b9   :  { %v674_v44 = vpop.eup %673 }
0x10ba   :  { %v492_v45 = vmul.f32 %v674_v44, %v801_v27 }
0x10bc   :  { %v493_v46 = vadd.f32 %v492_v45, %v804_v31 }
0x10be   :  { %v573_v47 = vpop.f32.mrf.mxu2  ;;  %496 = vrot.lane.b32.xlu1 %v493_v46, %s679_s1  ;;  %v494_v49 = vmul.f32 %v493_v46, %v452_v30 }
0x10bf   :  { %595 = vst [vmem:[%s962_s4 + $0x8] sm:$0xff] %v573_v47 }
0x1130   :  { %v497_v19 = vpop.permute.xlu1 %496 }
0x1131   :  { %v499_v48 = vmul.f32 %v497_v19, %v493_v46 }
0x1133   :  { %501 = vrot.lane.b32.xlu2 %v499_v48, %s680_s30 }
0x118d   :  { %v502_v50 = vpop.permute.xlu2 %501 }
0x118e   :  { %v504_v51 = vadd.f32 %v502_v50, %v494_v49 }
0x1190   :  { %675 = vtanh.f32 %v504_v51 }
0x1196   :  { %v676_v52 = vpop.eup %675 }
0x1197   :  { %507 = vrot.lane.b32.xlu0 %v676_v52, %s679_s1 }
0x1209   :  { %v508_v27 = vpop.permute.xlu0 %507 }
0x120a   :  { %v510_v31 = vmul.f32 %v508_v27, %v493_v46 }
0x120c   :  { %512 = vrot.lane.b32.xlu1 %v510_v31, %s680_s30 }
0x127e   :  { %v513_v53 = vpop.permute.xlu1 %512 }
0x127f   :  { %516 = vst.msk [vmem:[#allocation3 + $0x38] sm:$0xff] %vm102_vm3, %v513_v53 }
0x1286   :  { %v524_v54 = vld [vmem:[#allocation3 + $0x38] sm:$0xff] }
0x1287   :  { %620 = vmatmul.msk.f32.gmra.mxu3 %vm102_vm3, %v524_v54 }
0x130a   :  { %v591_v55 = vpop.f32.mrf.mxu3 }
0x130b   :  { %601 = vst [vmem:[%s962_s4 + $0x38] sm:$0xff] %v591_v55 }

</bundles_post_ra>
